<compile_context>
chip_gen: v7x
topology: tpu7x:2x2x1
jax: 0.10.0
libtpu: 0.0.40
codegen_flags: <defaults>
</compile_context>

<pallas_src>
import functools

import jax
import jax.numpy as jnp
from jax.experimental import pallas as pl
from jax.experimental.pallas import tpu as pltpu


@functools.lru_cache(maxsize=1)
def _vmem_limit_bytes():
    """Per-generation scoped-VMEM budget (~3/4 of physical, capped at 96 MiB)."""
    try:
        cap = pltpu.get_tpu_info().vmem_capacity_bytes
    except Exception:  # CPU emulation / info unavailable
        cap = 128 * 1024 * 1024
    return int(max(32 * 1024 * 1024, min(96 * 1024 * 1024, (cap * 3) // 4)))


# ----------------------------------------------------------------------------
# Kernel 1: M-tiled linear (matmul + bias) -- the patch embedding.
# ----------------------------------------------------------------------------
def _linear_kernel(x_ref, w_ref, b_ref, o_ref):
    o_ref[...] = (
        jnp.dot(x_ref[...].astype(jnp.bfloat16), w_ref[...],
                preferred_element_type=jnp.float32)
        + b_ref[...]
    )


def linear(x2d, w_bf16, b, *, tile_m=512):
    m, k = x2d.shape
    n = w_bf16.shape[1]
    tm = m if m <= tile_m else tile_m
    return pl.pallas_call(
        _linear_kernel,
        out_shape=jax.ShapeDtypeStruct((m, n), jnp.float32),
        grid=(pl.cdiv(m, tm),),
        in_specs=[
            pl.BlockSpec((tm, k), lambda i: (i, 0)),   # activations, tiled on M
            pl.BlockSpec((k, n), lambda i: (0, 0)),    # weight, resident
            pl.BlockSpec((1, n), lambda i: (0, 0)),    # bias, resident
        ],
        out_specs=pl.BlockSpec((tm, n), lambda i: (i, 0)),
        compiler_params=pltpu.CompilerParams(
            dimension_semantics=("parallel",),
            vmem_limit_bytes=_vmem_limit_bytes()),
    )(x2d, w_bf16, b.reshape(1, n))


# ----------------------------------------------------------------------------
# Kernel 2: the FULL transformer (all layers) + fused cls head, one pallas_call.
#   grid = (batch, depth); batch "parallel" (megacore), depth "arbitrary".
#   Shared attn/FF weights and LN tables -> constant index maps (VMEM-resident).
#   Residual stream carried in a persistent VMEM scratch; only [1, out_dim]
#   logits per image are written to HBM (at the last layer).
# ----------------------------------------------------------------------------
def _transformer_kernel(
    x_ref, ln1g_ref, ln1b_ref, ln2g_ref, ln2b_ref,
    wqkv_ref, wo_ref, bo_ref, w1_ref, b1_ref, w2_ref, b2_ref,
    hg_ref, hb_ref, hw_ref, hbias_ref,
    o_ref, resid_ref, ctx_ref,
    *, heads, dim_head, n_valid,
):
    eps = 1e-5
    scale = dim_head ** (-0.5)
    inner = heads * dim_head
    n_pad = resid_ref.shape[0]
    l = pl.program_id(1)
    depth = pl.num_programs(1)

    # Layer 0: load this batch element's tokens into the resident scratch.
    @pl.when(l == 0)
    def _init():
        resid_ref[...] = x_ref[0]

    def layer_norm(v, g, b):
        mu = jnp.mean(v, axis=-1, keepdims=True)
        var = jnp.mean((v - mu) ** 2, axis=-1, keepdims=True)
        return (v - mu) * jax.lax.rsqrt(var + eps) * g + b

    x = resid_ref[...]  # [N, D] float32 residual stream

    # ---- PreNorm + Multi-head attention -------------------------------------
    g1 = ln1g_ref[pl.ds(l, 1), :]
    bb1 = ln1b_ref[pl.ds(l, 1), :]
    xn = layer_norm(x, g1, bb1)
    # One lane-dense QKV projection over all heads: [N, D] @ [D, 3*inner]
    qkv = jnp.dot(xn.astype(jnp.bfloat16), wqkv_ref[...],
                  preferred_element_type=jnp.float32)          # [N, 3*inner] f32

    # Mask for padded key columns (hoisted out of the head loop).
    if n_valid < n_pad:
        key_valid = jax.lax.broadcasted_iota(jnp.int32, (n_pad, n_pad), 1) < n_valid

    for h in range(heads):  # static unroll; per-head values die at the ctx store
        lo = h * dim_head
        q_h = qkv[:, lo:lo + dim_head].astype(jnp.bfloat16)
        k_h = qkv[:, inner + lo:inner + lo + dim_head].astype(jnp.bfloat16)
        v_h = qkv[:, 2 * inner + lo:2 * inner + lo + dim_head].astype(jnp.bfloat16)
        # q @ k^T without explicit transpose
        dots = jax.lax.dot_general(
            q_h, k_h, (((1,), (1,)), ((), ())),
            preferred_element_type=jnp.float32) * scale
        if n_valid < n_pad:
            dots = jnp.where(key_valid, dots, -1e30)
        dots = dots - jnp.max(dots, axis=-1, keepdims=True)
        e = jnp.exp(dots)
        attn = e * pl.reciprocal(jnp.sum(e, axis=-1, keepdims=True), approx=True)
        ctx_ref[:, lo:lo + dim_head] = jnp.dot(
            attn.astype(jnp.bfloat16), v_h, preferred_element_type=jnp.float32)

    # Single K=inner output projection: concat(heads) @ Wo
    attn_out = jnp.dot(ctx_ref[...].astype(jnp.bfloat16), wo_ref[...],
                       preferred_element_type=jnp.float32) + bo_ref[...]
    x = x + attn_out

    # ---- PreNorm + FeedForward ----------------------------------------------
    g2 = ln2g_ref[pl.ds(l, 1), :]
    bb2 = ln2b_ref[pl.ds(l, 1), :]
    xn2 = layer_norm(x, g2, bb2)
    h1 = jnp.dot(xn2.astype(jnp.bfloat16), w1_ref[...],
                 preferred_element_type=jnp.float32) + b1_ref[...]
    h1 = jax.nn.gelu(h1, approximate=False)  # exact erf GELU (PyTorch nn.GELU default)
    ff = jnp.dot(h1.astype(jnp.bfloat16), w2_ref[...],
                 preferred_element_type=jnp.float32) + b2_ref[...]
    x = x + ff
    resid_ref[...] = x

    # ---- Last layer: fused cls-token LayerNorm + Linear head ---------------
    @pl.when(l == depth - 1)
    def _final():
        cls_tok = x[0:1, :]                                    # [1, D]
        mu = jnp.mean(cls_tok, axis=-1, keepdims=True)
        var = jnp.mean((cls_tok - mu) ** 2, axis=-1, keepdims=True)
        cls_n = (cls_tok - mu) * jax.lax.rsqrt(var + eps) * hg_ref[...] + hb_ref[...]
        o_ref[0] = (
            jnp.dot(cls_n.astype(jnp.bfloat16), hw_ref[...],
                    preferred_element_type=jnp.float32)
            + hbias_ref[...]
        )


def transformer_head(x, params, *, depth, heads, dim_head, n_valid):
    b_sz, n_pad, d = x.shape
    inner = heads * dim_head
    mlp = params["ff_w1"].shape[1]
    out_dim = params["head_w"].shape[1]

    const = lambda shape: pl.BlockSpec(shape, lambda b, l: tuple(0 for _ in shape))

    out = pl.pallas_call(
        functools.partial(_transformer_kernel, heads=heads, dim_head=dim_head,
                          n_valid=n_valid),
        out_shape=jax.ShapeDtypeStruct((b_sz, 1, out_dim), jnp.float32),
        grid=(b_sz, depth),
        in_specs=[
            pl.BlockSpec((1, n_pad, d), lambda b, l: (b, 0, 0)),  # tokens (layer 0)
            const((depth, d)), const((depth, d)),                 # ln1 gamma / beta table
            const((depth, d)), const((depth, d)),                 # ln2 gamma / beta table
            const((d, 3 * inner)),                                # Wqkv (bf16, resident)
            const((inner, d)),                                    # Wo   (bf16, resident)
            const((1, d)),                                        # bo
            const((d, mlp)),                                      # W1   (bf16, resident)
            const((1, mlp)),                                      # b1
            const((mlp, d)),                                      # W2   (bf16, resident)
            const((1, d)),                                        # b2
            const((1, d)), const((1, d)),                         # head LN gamma / beta
            const((d, out_dim)),                                  # head W (bf16)
            const((1, out_dim)),                                  # head bias
        ],
        out_specs=pl.BlockSpec((1, 1, out_dim), lambda b, l: (b, 0, 0)),
        scratch_shapes=[
            pltpu.VMEM((n_pad, d), jnp.float32),      # residual stream (carried)
            pltpu.VMEM((n_pad, inner), jnp.float32),  # per-head context buffer
        ],
        compiler_params=pltpu.CompilerParams(
            dimension_semantics=("parallel", "arbitrary"),
            vmem_limit_bytes=_vmem_limit_bytes()),
    )(
        x,
        params["ln1_g"], params["ln1_b"], params["ln2_g"], params["ln2_b"],
        params["w_qkv"], params["w_out"], params["b_out"].reshape(1, d),
        params["ff_w1"], params["ff_b1"].reshape(1, mlp),
        params["ff_w2"], params["ff_b2"].reshape(1, d),
        params["head_ln_g"].reshape(1, d), params["head_ln_b"].reshape(1, d),
        params["head_w"], params["head_b"].reshape(1, out_dim),
    )
    return out.reshape(b_sz, out_dim)


# ----------------------------------------------------------------------------
# ViT forward (glue in plain JAX, compute in Pallas kernels above).
# ----------------------------------------------------------------------------
def vit_forward(img, params, *, patch, heads, dim_head, depth):
    B, C, H, W = img.shape
    hn, wn = H // patch, W // patch
    # rearrange 'b c (h p1) (w p2) -> b (h w) (p1 p2 c)'  (cast to bf16 here so it
    # fuses with the transpose and halves the HBM read into the patch linear)
    x = img.reshape(B, C, hn, patch, wn, patch)
    x = jnp.transpose(x, (0, 2, 4, 3, 5, 1))                 # [B, hn, wn, p1, p2, C]
    x = x.reshape(B, hn * wn, patch * patch * C).astype(jnp.bfloat16)

    patch_dim = x.shape[-1]
    D = params["patch_w"].shape[1]
    num_patches = hn * wn

    # patch embedding linear (Pallas kernel, batch folded into M)
    x = linear(x.reshape(B * num_patches, patch_dim),
               params["patch_w"], params["patch_b"]).reshape(B, num_patches, D)

    # cls token + positional embedding (glue)
    cls = jnp.broadcast_to(params["cls_token"], (B, 1, D)).astype(jnp.float32)
    x = jnp.concatenate([cls, x], axis=1)
    x = x + params["pos_embedding"][:, :num_patches + 1]
    # TODO(synk): Dropout layers are identity here (inference-mode semantics).

    # pad tokens to a sublane multiple; padded key columns are masked in-kernel
    # and padded rows never reach the (token 0) cls head output.
    n_valid = num_patches + 1
    n_pad = ((n_valid + 7) // 8) * 8
    if n_pad != n_valid:
        x = jnp.pad(x, ((0, 0), (0, n_pad - n_valid), (0, 0)))

    # full transformer + fused cls LayerNorm/Linear head in one pallas_call
    return transformer_head(x, params, depth=depth, heads=heads,
                            dim_head=dim_head, n_valid=n_valid)


# ----------------------------------------------------------------------------
# Deterministic parameter construction (matmul weights pre-cast to bf16).
# ----------------------------------------------------------------------------
def make_params(key, *, channels, patch, num_patches, embed_dim, depth,
                heads, dim_head, mlp_dim, output_dim):
    inner = heads * dim_head
    patch_dim = channels * patch * patch
    ks = jax.random.split(key, 12)
    s = 0.02
    params = {
        "patch_w": (s * jax.random.normal(ks[0], (patch_dim, embed_dim),
                                          jnp.float32)).astype(jnp.bfloat16),
        "patch_b": jnp.zeros((embed_dim,), jnp.float32),
        "pos_embedding": jax.random.normal(ks[1], (1, num_patches + 1, embed_dim),
                                           jnp.float32),
        "cls_token": jax.random.normal(ks[2], (1, 1, embed_dim), jnp.float32),
        # shared attention weights (reused by every layer, as in the PyTorch module)
        "w_qkv": (s * jax.random.normal(ks[3], (embed_dim, 3 * inner),
                                        jnp.float32)).astype(jnp.bfloat16),
        "w_out": (s * jax.random.normal(ks[4], (inner, embed_dim),
                                        jnp.float32)).astype(jnp.bfloat16),
        "b_out": jnp.zeros((embed_dim,), jnp.float32),
        # shared feed-forward weights
        "ff_w1": (s * jax.random.normal(ks[5], (embed_dim, mlp_dim),
                                        jnp.float32)).astype(jnp.bfloat16),
        "ff_b1": jnp.zeros((mlp_dim,), jnp.float32),
        "ff_w2": (s * jax.random.normal(ks[6], (mlp_dim, embed_dim),
                                        jnp.float32)).astype(jnp.bfloat16),
        "ff_b2": jnp.zeros((embed_dim,), jnp.float32),
        # per-layer pre-norm LayerNorms (PyTorch default init: ones / zeros)
        "ln1_g": jnp.ones((depth, embed_dim), jnp.float32),
        "ln1_b": jnp.zeros((depth, embed_dim), jnp.float32),
        "ln2_g": jnp.ones((depth, embed_dim), jnp.float32),
        "ln2_b": jnp.zeros((depth, embed_dim), jnp.float32),
        # head
        "head_ln_g": jnp.ones((embed_dim,), jnp.float32),
        "head_ln_b": jnp.zeros((embed_dim,), jnp.float32),
        "head_w": (s * jax.random.normal(ks[7], (embed_dim, output_dim),
                                         jnp.float32)).astype(jnp.bfloat16),
        "head_b": jnp.zeros((output_dim,), jnp.float32),
    }
    return params


if __name__ == "__main__":
    # Small shapes consistent with the module's constructor contract.
    B, C = 2, 3
    image_size, patch = 16, 8
    embed_dim, depth, heads, dim_head = 32, 2, 4, 8
    mlp_dim, output_dim = 64, 16
    num_patches = (image_size // patch) ** 2  # 4

    key = jax.random.PRNGKey(0)
    k_img, k_par = jax.random.split(key)
    img = jax.random.normal(k_img, (B, C, image_size, image_size), jnp.float32)
    params = make_params(k_par, channels=C, patch=patch, num_patches=num_patches,
                         embed_dim=embed_dim, depth=depth, heads=heads,
                         dim_head=dim_head, mlp_dim=mlp_dim, output_dim=output_dim)

    out = vit_forward(img, params, patch=patch, heads=heads,
                      dim_head=dim_head, depth=depth)
    out = jax.block_until_ready(out)
    assert out.shape == (B, output_dim), out.shape
    print("KERNEL_OK")
</pallas_src>

<mosaic_0001>
module attributes {stable_mosaic.version = 11 : i64} {
  func.func @_linear_kernel(%arg0: i32, %arg1: memref<8x192xbf16, #tpu.memory_space<vmem>>, %arg2: memref<192x32xbf16, #tpu.memory_space<vmem>>, %arg3: memref<1x32xf32, #tpu.memory_space<vmem>>, %arg4: memref<8x32xf32, #tpu.memory_space<vmem>>) attributes {dimension_semantics = [#tpu.dimension_semantics<parallel>], iteration_bounds = array<i64: 1>, scalar_prefetch = 0 : i64, scratch_operands = 0 : i64, tpu.core_type = #tpu.core_type<tc>, window_params = [{transform_indices = @transform_0, window_bounds = array<i64: 8, 192>}, {pipeline_mode = #tpu.pipeline_mode<synchronous>, transform_indices = @transform_1, window_bounds = array<i64: 192, 32>}, {pipeline_mode = #tpu.pipeline_mode<synchronous>, transform_indices = @transform_2, window_bounds = array<i64: 1, 32>}, {transform_indices = @transform_3, window_bounds = array<i64: 8, 32>}]} {
    %c0 = arith.constant 0 : index
    %c0_0 = arith.constant 0 : index
    %0 = vector.load %arg1[%c0, %c0_0] : memref<8x192xbf16, #tpu.memory_space<vmem>>, vector<8x192xbf16>
    %c0_1 = arith.constant 0 : index
    %c0_2 = arith.constant 0 : index
    %1 = vector.load %arg2[%c0_1, %c0_2] : memref<192x32xbf16, #tpu.memory_space<vmem>>, vector<192x32xbf16>
    %cst = arith.constant dense<0.000000e+00> : vector<8x32xf32>
    %2 = tpu.matmul %0, %1, %cst {dimension_numbers = #tpu.dot_dimension_numbers<[1], [0], [0], [1], [0, 0, 1, 1], [], []>} : vector<8x192xbf16>, vector<192x32xbf16>, vector<8x32xf32> -> vector<8x32xf32>
    %c0_3 = arith.constant 0 : index
    %c0_4 = arith.constant 0 : index
    %3 = vector.load %arg3[%c0_3, %c0_4] : memref<1x32xf32, #tpu.memory_space<vmem>>, vector<1x32xf32>
    %4 = vector.broadcast %3 : vector<1x32xf32> to vector<8x32xf32>
    %5 = arith.addf %2, %4 : vector<8x32xf32>
    %c0_5 = arith.constant 0 : index
    %c0_6 = arith.constant 0 : index
    %6 = vector.load %arg4[%c0_5, %c0_6] : memref<8x32xf32, #tpu.memory_space<vmem>>, vector<8x32xf32>
    tpu.vector_store %arg4[%c0_5, %c0_6], %5 {strides = array<i32>} : memref<8x32xf32, #tpu.memory_space<vmem>>, vector<8x32xf32>,
    return
  }
  func.func @transform_0(%arg0: i32) -> (i32, i32) {
    %c0_i32 = arith.constant 0 : i32
    %c0_i32_0 = arith.constant 0 : i32
    return %arg0, %c0_i32 : i32, i32
  }
  func.func @transform_1(%arg0: i32) -> (i32, i32) {
    %c0_i32 = arith.constant 0 : i32
    %c0_i32_0 = arith.constant 0 : i32
    %c0_i32_1 = arith.constant 0 : i32
    return %c0_i32, %c0_i32_0 : i32, i32
  }
  func.func @transform_2(%arg0: i32) -> (i32, i32) {
    %c0_i32 = arith.constant 0 : i32
    %c0_i32_0 = arith.constant 0 : i32
    %c0_i32_1 = arith.constant 0 : i32
    return %c0_i32, %c0_i32_0 : i32, i32
  }
  func.func @transform_3(%arg0: i32) -> (i32, i32) {
    %c0_i32 = arith.constant 0 : i32
    %c0_i32_0 = arith.constant 0 : i32
    return %arg0, %c0_i32 : i32, i32
  }
}

</mosaic_0001>

<bundles_post_ra>
// kernel: tpu_custom_call.1
= control target key start
LH: loop header
LB: loop body
LE: loop exit
PB: predicated region body
PF: predicated region fallthrough
CT: control target
= control target key end

     0   :  { %8 = vsyncpa [#allocation3], 0  ;;  %s431_s0 = inlined_call_operand.hbm [shape: bf16[8,192], index: 0, kind: input, shape index: {}]   ;;  %s432_s1 = inlined_call_operand.hbm [shape: bf16[192,32], index: 1, kind: input, shape index: {}]   ;;  %s433_s2 = inlined_call_operand.hbm [shape: f32[1,32], index: 2, kind: input, shape index: {}]   ;;  %s434_s3 = inlined_call_operand.hbm [shape: f32[8,32], index: 3, kind: output, shape index: {}]  }
   0x1   :  { %9 = vsyncpa [#allocation6], 0 }
   0x2   :  { %10 = vsyncpa [#allocation4], 0  ;;  %s356_s12 = smov [#allocation5]   ;;  %s262_s16 = scalar_lea.hbm %s432_s1, 1536 }
   0x3   :  { %s26_s13 = sshll.u32 %s356_s12, 4  ;;  %p263_p0 = scmp.ne.s32.totalorder %s432_s1, %s262_s16  ;;  %s27_s13 = int_to_ptr.vmem [resolvable:$true] %s26_s13 }
   0x4   :  { %p266_p1 = scmp.lt.u32.totalorder %s262_s16, %s432_s1 }
   0x6   :  { %p268_p2 = pnand %p266_p1, %p263_p0 }
   0x8   :  { %271 = shalt.err (!%p268_p2)
}
   0x9   :  { %s272_s21 = scalar_lea.vmem %s27_s13, 1536  ;;  %p277_p4 = scmp.lt.s32.totalorder %s27_s13, %s27_s13 }
   0xa   :  { %p273_p3 = scmp.ne.s32.totalorder %s27_s13, %s272_s21  ;;  %p278_p5 = scmp.lt.s32.totalorder %s272_s21, %s272_s21 }
   0xc   :  { %p279_p6 = por %p278_p5, %p277_p4 }
   0xe   :  { %p280_p7 = pnand %p279_p6, %p273_p3 }
  0x10   :  { %283 = shalt.err (!%p280_p7)
}
  0x11   :  { %s357_s22 = smov 64   ;;  %s358_s23 = smov 4  }
  0x12   :  { %32 = dma.hbm_to_vmem [thread:$0]  %s432_s1, 1536, %s27_s13, [#allocation6], %s357_s22, %s357_s22, %s358_s23  }
  0x13   :  { %s359_s26 = smov [#allocation2]   ;;  %s360_s28 = smov [#allocation7]  }
  0x14   :  { %s17_s27 = sshll.u32 %s359_s26, 4  ;;  %s39_s29 = sshll.u32 %s360_s28, 4  ;;  %s18_s27 = int_to_ptr.vmem [resolvable:$true] %s17_s27  ;;  %s40_s29 = int_to_ptr.vmem [resolvable:$true] %s39_s29 }
  0x15   :  { %s284_s5 = scalar_lea.hbm %s431_s0, 128 }
  0x16   :  { %p285_p8 = scmp.ne.s32.totalorder %s431_s0, %s284_s5  ;;  %p288_p9 = scmp.lt.u32.totalorder %s284_s5, %s431_s0 }
  0x18   :  { %p290_p10 = pnand %p288_p9, %p285_p8 }
  0x1a   :  { %293 = shalt.err (!%p290_p10)
}
  0x1b   :  { %s294_s1 = scalar_lea.vmem %s18_s27, 128  ;;  %p299_p12 = scmp.lt.s32.totalorder %s18_s27, %s18_s27 }
  0x1c   :  { %p295_p11 = scmp.ne.s32.totalorder %s18_s27, %s294_s1  ;;  %p300_p13 = scmp.lt.s32.totalorder %s294_s1, %s294_s1 }
  0x1e   :  { %p301_p0 = por %p300_p13, %p299_p12 }
  0x20   :  { %p302_p1 = pnand %p301_p0, %p295_p11 }
  0x22   :  { %305 = shalt.err (!%p302_p1)
}
  0x23   :  { %20 = dma.hbm_to_vmem [thread:$0]  %s431_s0, 128, %s18_s27, [#allocation3]  }
  0x24   :  { %s306_s14 = scalar_lea.hbm %s433_s2, 16 }
  0x25   :  { %p307_p2 = scmp.ne.s32.totalorder %s433_s2, %s306_s14  ;;  %p310_p3 = scmp.lt.u32.totalorder %s306_s14, %s433_s2 }
  0x27   :  { %p312_p4 = pnand %p310_p3, %p307_p2 }
  0x29   :  { %315 = shalt.err (!%p312_p4)
}
  0x2a   :  { %s316_s19 = scalar_lea.vmem %s40_s29, 16  ;;  %s320_s20 = scalar_lea.vmem %s40_s29, 32 }
  0x2b   :  { %p317_p5 = scmp.ne.s32.totalorder %s40_s29, %s316_s19  ;;  %p321_p6 = scmp.lt.s32.totalorder %s40_s29, %s40_s29 }
  0x2c   :  { %p322_p7 = scmp.lt.s32.totalorder %s320_s20, %s316_s19 }
  0x2e   :  { %p323_p8 = por %p322_p7, %p321_p6 }
  0x30   :  { %p324_p9 = pnand %p323_p8, %p317_p5 }
  0x32   :  { %327 = shalt.err (!%p324_p9)
}
  0x33   :  { %42 = dma.hbm_to_vmem [thread:$0]  %s433_s2, 16, %s40_s29, [#allocation6]  }
  0x34   :  { %350 = dma.done.wait [#allocation3], 128  }
  0x35   :  { %351 = vsyncadd [#allocation3], 4294967168 }
  0x36   :  { %352 = dma.done.wait [#allocation6], 1552  }
  0x37   :  { %353 = vsyncadd [#allocation6], 4294965744  ;;  %v361_v0 = vmov 0   ;;  %v248_v1 = vld [vmem:[#allocation5] sm:$0xff]   ;;  %v249_v2 = vld [vmem:[#allocation5 + $0x8] sm:$0xff]   ;;  %vm163_vm0 = vcmask 523264  }
  0x38   :  { %167 = vmatprep.subr.bf16.mxu0 %v361_v0  ;;  %v250_v3 = vld [vmem:[#allocation5 + $0x10] sm:$0xff]   ;;  %v251_v4 = vld [vmem:[#allocation5 + $0x18] sm:$0xff]   ;;  %v252_v7 = vld [vmem:[#allocation5 + $0x20] sm:$0xff]   ;;  %s362_s2 = smov [#allocation8]   ;;  %vm207_vm1 = vcmask 261120  }
  0x39   :  { %168 = vmatpush1.bf16.msra.mxu0 %v248_v1  ;;  %v53_v5 = vld [vmem:[#allocation2] sm:$0xff]  ;;  %v253_v8 = vld [vmem:[#allocation5 + $0x28] sm:$0xff]   ;;  %v254_v9 = vld [vmem:[#allocation5 + $0x30] sm:$0xff]   ;;  %s215_s22 = sshll.u32 %s362_s2, 4  ;;  %s216_s22 = int_to_ptr.vmem [resolvable:$true] %s215_s22 }
  0x3a   :  { %169 = vmatprep.subr.bf16.mxu0 %v361_v0  ;;  %v227_v6 = vcombine.high %v53_v5, %v53_v5  ;;  %v255_v10 = vld [vmem:[#allocation5 + $0x38] sm:$0xff]   ;;  %v256_v11 = vld [vmem:[#allocation5 + $0x40] sm:$0xff]   ;;  %v257_v12 = vld [vmem:[#allocation5 + $0x48] sm:$0xff]   ;;  %v226_v15 = vcombine.low %v53_v5, %v53_v5  ;;  %s328_s23 = scalar_lea.vmem %s216_s22, 128  ;;  %p333_p11 = scmp.lt.s32.totalorder %s216_s22, %s216_s22 }
  0x3b   :  { %v258_v13 = vld [vmem:[#allocation5 + $0x50] sm:$0xff]   ;;  %v259_v14 = vld [vmem:[#allocation5 + $0x58] sm:$0xff]   ;;  %v225_v16 = vld [vmem:[#allocation7] ss:$0 sm:$0xff]  ;;  %p329_p10 = scmp.ne.s32.totalorder %s216_s22, %s328_s23  ;;  %p334_p12 = scmp.lt.s32.totalorder %s328_s23, %s328_s23 }
  0x3c   :  { %240 = vmatprep.mubr.msk.bf16.mxu0 %vm163_vm0, %v227_v6 }
  0x3d   :  { %170 = vmatpush1.bf16.msra.mxu0 %v249_v2  ;;  %p335_p13 = por %p334_p12, %p333_p11 }
  0x3e   :  { %171 = vmatprep.subr.bf16.mxu0 %v361_v0 }
  0x3f   :  { %p336_p0 = pnand %p335_p13, %p329_p10 }
  0x41   :  { %172 = vmatpush1.bf16.msra.mxu0 %v250_v3 }
  0x42   :  { %173 = vmatprep.subr.bf16.mxu0 %v361_v0 }
  0x45   :  { %174 = vmatpush1.bf16.msra.mxu0 %v251_v4 }
  0x46   :  { %175 = vmatprep.subr.bf16.mxu0 %v361_v0 }
  0x49   :  { %176 = vmatpush1.bf16.msra.mxu0 %v252_v7 }
  0x4a   :  { %177 = vmatprep.subr.bf16.mxu0 %v361_v0 }
  0x4d   :  { %178 = vmatpush1.bf16.msra.mxu0 %v253_v8 }
  0x4e   :  { %179 = vmatprep.subr.bf16.mxu0 %v361_v0 }
  0x51   :  { %180 = vmatpush1.bf16.msra.mxu0 %v254_v9 }
  0x52   :  { %181 = vmatprep.subr.bf16.mxu0 %v361_v0 }
  0x55   :  { %182 = vmatpush1.bf16.msra.mxu0 %v255_v10 }
  0x56   :  { %183 = vmatprep.subr.bf16.mxu0 %v361_v0 }
  0x59   :  { %184 = vmatpush1.bf16.msra.mxu0 %v256_v11 }
  0x5a   :  { %185 = vmatprep.subr.bf16.mxu0 %v361_v0 }
  0x5d   :  { %186 = vmatpush1.bf16.msra.mxu0 %v257_v12 }
  0x5e   :  { %187 = vmatprep.subr.bf16.mxu0 %v361_v0 }
  0x61   :  { %188 = vmatpush1.bf16.msra.mxu0 %v258_v13 }
  0x62   :  { %189 = vmatprep.subr.bf16.mxu0 %v361_v0 }
  0x65   :  { %190 = vmatpush1.bf16.msra.mxu0 %v259_v14 }
  0x68   :  { %200 = vmatmul.mubr.bf16.vlgmr.msra.gmra.mrb[0].mxu0 %v226_v15 }
 0x13b   :  { %v201_v17 = vpop.f32.mrb[0].mxu0 }
 0x13c   :  { %v202_v18 = vadd.f32 %v225_v16, %v201_v17  ;;  %v203_v19 = vpop.f32.mrb[1].mxu0 }
 0x13d   :  { %v204_v20 = vpop.f32.mrb[2].mxu0 }
 0x13e   :  { %v205_v21 = vpop.f32.mrb[3].mxu0  ;;  %208 = vst.msk [vmem:[#allocation8] sm:$0xff] %vm207_vm1, %v202_v18 }
 0x13f   :  { %339 = shalt.err (!%p336_p0)
}
 0x140   :  { %s340_s26 = scalar_lea.hbm %s434_s3, 128 }
 0x141   :  { %p341_p1 = scmp.ne.s32.totalorder %s434_s3, %s340_s26  ;;  %p344_p2 = scmp.lt.u32.totalorder %s340_s26, %s434_s3 }
 0x143   :  { %p346_p3 = pnand %p344_p2, %p341_p1 }
 0x145   :  { %349 = shalt.err (!%p346_p3)
}
 0x146   :  { %218 = dma.vmem_to_hbm [thread:$0]  %s216_s22, 128, %s434_s3, [#allocation4]  }
 0x147   :  { %354 = dma.done.wait [#allocation4], 128  }
 0x148   :  { %355 = vsyncadd [#allocation4], 4294967168 }
 0x149   :  { %222 = vsyncpa [#allocation3], 1 }
 0x14a   :  { %223 = vsyncpa [#allocation6], 1 }
 0x14b   :  { %224 = vsyncpa [#allocation4], 1 }

</bundles_post_ra>
